<compile_context>
chip_gen: v6e
topology: v6e:2x2x1
jax: 0.10.0
libtpu: 0.0.40
codegen_flags: <defaults>
</compile_context>

<pallas_src>
import functools

import jax
import jax.numpy as jnp
from jax.experimental import pallas as pl
from jax.experimental.pallas import tpu as pltpu

_LANE = 128
_SUBLANE = 8
# Conservative double-buffered working-set budget: fits v5e's 16 MiB scoped VMEM
# default with headroom (v6e/v7x scoped default is 32 MiB).
_VMEM_BUDGET = 12 * 1024 * 1024


def _round_up(x, m):
    return (x + m - 1) // m * m


def _choose_tiles(B, N, D, itemsize):
    """Pick (tb, b_pad, tn, n_pad) for grid (b_pad//tb, n_pad//tn).

    tb ~ 8 batch rows per step amortizes the fixed per-grid-step overhead; tn is a
    lane-dense multiple of 128 (or the full, sublane-padded N when N <= 128), sized
    so double-buffered streamed blocks + gather scratch stay under the v5e-safe
    VMEM budget.
    """
    tb = _SUBLANE if B >= _SUBLANE else B        # tb < 8 must equal the (padded) B
    b_pad = _round_up(B, tb)
    if N <= _LANE:
        n_pad = _round_up(N, _SUBLANE)           # multiple of 8 -> clean sublane tiling
        tn = n_pad
    else:
        n_pad = _round_up(N, _LANE)
        tn = _LANE
        for t in (256, 384, 512):                # keep the largest lane-dense divisor that fits
            if n_pad % t == 0 and (3 * tb * t * D * itemsize + 2 * tb * t * 4) <= _VMEM_BUDGET:
                tn = t
    # TODO(synk): for D >~ 2K the tb=8, tn=128 floor could still exceed the budget;
    # unrealistic for TransE embedding sizes, so not handled.
    return tb, b_pad, tn, n_pad


def _transe_dense_kernel(h_ref, r_ref, t_ref, o_ref, *, gamma, head_batch):
    """Dense blocks: h/r/t are (TB, TN|1, D) bf16 (singletons broadcast on the VPU);
    output block is (TB, TN) f32."""
    h = h_ref[...]
    r = r_ref[...]
    t = t_ref[...]
    # bf16 elementwise (VPU); verbatim TransE from the PyTorch module.
    s = h * (r * t) if head_batch else h + r - t
    # L1 over the embedding dim, accumulated in f32.
    # TODO(synk): on v7x this XLU lane-reduce could move onto the idle MXU as
    # |s| @ ones((D,1), bf16) if profiling shows compute slots binding.
    o_ref[...] = gamma - jnp.sum(jnp.abs(s).astype(jnp.float32), axis=-1)


def _transe_gather_kernel(ids_ref, a_ref, b_ref, ent_ref, o_ref, gbuf, sem, *,
                          gamma, head_batch, tb, tn):
    """Fused-gather TransE block.

    ids_ref : (B_pad, N_pad) int32 in SMEM (scalar prefetch) -- entity row ids.
    a_ref/b_ref : (TB, 1, D) bf16 singleton operands.
    ent_ref : (E, D) bf16 entity table left in HBM (pl.ANY).
    o_ref   : (TB, TN) f32 scores.
    gbuf    : (TB*TN, D) VMEM scratch for gathered rows; sem: one DMA semaphore.
    """
    b0 = pl.program_id(0) * tb
    n0 = pl.program_id(1) * tn

    # Issue one row-gather DMA per candidate (all in flight at once), then drain.
    # TODO(synk): double-buffer the gather across grid steps (prefetch step n+1's
    # rows while computing step n) to hide gather latency behind compute.
    def issue(k, carry):
        i = k // tn
        j = k - i * tn
        row = ids_ref[b0 + i, n0 + j]
        pltpu.make_async_copy(ent_ref.at[row], gbuf.at[k], sem.at[0]).start()
        return carry

    jax.lax.fori_loop(0, tb * tn, issue, 0)

    def drain(k, carry):
        # Same-shaped descriptor as every issued copy -> correct wait accounting.
        pltpu.make_async_copy(ent_ref.at[0], gbuf.at[0], sem.at[0]).wait()
        return carry

    jax.lax.fori_loop(0, tb * tn, drain, 0)

    a = a_ref[...]                                    # (tb, 1, D) bf16
    b = b_ref[...]                                    # (tb, 1, D) bf16
    for i in range(tb):                               # static unroll, tb <= 8
        g_i = gbuf[pl.ds(i * tn, tn), :]              # (tn, D) gathered rows for batch row i
        if head_batch:
            s = g_i * (a[i] * b[i])                   # head * (relation * tail); head gathered
        else:
            s = (a[i] + b[i]) - g_i                   # head + relation - tail; tail gathered
        o_ref[i, :] = gamma - jnp.sum(jnp.abs(s).astype(jnp.float32), axis=-1)


def transe_score(head, relation, tail, gamma, mode="single"):
    """Dense-operand scoring. head/relation/tail: (B, {1|N}, D) bf16 -> (B, N) f32."""
    B = max(head.shape[0], relation.shape[0], tail.shape[0])
    N = max(head.shape[1], relation.shape[1], tail.shape[1])
    D = head.shape[2]
    itemsize = jnp.dtype(head.dtype).itemsize
    tb, b_pad, tn, n_pad = _choose_tiles(B, N, D, itemsize)

    def pad_operand(x):
        assert x.shape[0] in (1, B) and x.shape[1] in (1, N) and x.shape[2] == D
        pb = b_pad - x.shape[0]
        pn = (n_pad - x.shape[1]) if x.shape[1] != 1 else 0
        return jnp.pad(x, ((0, pb), (0, pn), (0, 0))) if (pb or pn) else x

    head, relation, tail = (pad_operand(x) for x in (head, relation, tail))

    def spec(x):
        if x.shape[1] == 1:
            # singleton operand: (tb,1,D) fetched once per b-step (candidate axis is
            # innermost, so this block is not re-DMA'd), broadcast on the VPU in-kernel.
            return pl.BlockSpec((tb, 1, D), lambda b, n: (b, 0, 0))
        return pl.BlockSpec((tb, tn, D), lambda b, n: (b, n, 0))

    kernel = functools.partial(_transe_dense_kernel, gamma=float(gamma),
                               head_batch=(mode == "head-batch"))
    cost = pl.CostEstimate(
        flops=3 * b_pad * n_pad * D, transcendentals=0,
        bytes_accessed=(head.size + relation.size + tail.size) * itemsize + b_pad * n_pad * 4)

    out = pl.pallas_call(
        kernel,
        out_shape=jax.ShapeDtypeStruct((b_pad, n_pad), jnp.float32),
        grid_spec=pltpu.PrefetchScalarGridSpec(
            num_scalar_prefetch=0,
            grid=(b_pad // tb, n_pad // tn),
            in_specs=[spec(head), spec(relation), spec(tail)],
            out_specs=pl.BlockSpec((tb, tn), lambda b, n: (b, n)),
        ),
        compiler_params=pltpu.CompilerParams(
            dimension_semantics=("parallel", "parallel")),
        cost_estimate=cost,
    )(head, relation, tail)
    return out[:B, :N]


def transe_score_fused_gather(neg_ids, single_a, single_b, entity_table, gamma, mode):
    """Batch-mode scoring with the (B,N,D) entity gather fused into the kernel.

    mode='head-batch': gathered rows are heads; single_a=relation, single_b=tail.
    mode='tail-batch': gathered rows are tails; single_a=head,     single_b=relation.
    neg_ids (B,N) int32; single_a/single_b (B,1,D) bf16; entity_table (E,D) bf16 (stays in HBM).
    Returns (B, N) f32.
    """
    B, N = neg_ids.shape
    D = entity_table.shape[1]
    itemsize = jnp.dtype(entity_table.dtype).itemsize
    tb, b_pad, tn, n_pad = _choose_tiles(B, N, D, itemsize)

    if (b_pad, n_pad) != (B, N):
        neg_ids = jnp.pad(neg_ids, ((0, b_pad - B), (0, n_pad - N)))  # pad ids -> row 0 (valid)
    if b_pad != B:
        single_a = jnp.pad(single_a, ((0, b_pad - B), (0, 0), (0, 0)))
        single_b = jnp.pad(single_b, ((0, b_pad - B), (0, 0), (0, 0)))

    # TODO(synk): for very large B*N the prefetched id array may press on SMEM
    # capacity; switch to a per-block SMEM BlockSpec for the ids in that regime.
    kernel = functools.partial(_transe_gather_kernel, gamma=float(gamma),
                               head_batch=(mode == "head-batch"), tb=tb, tn=tn)
    cost = pl.CostEstimate(
        flops=3 * b_pad * n_pad * D, transcendentals=0,
        bytes_accessed=b_pad * n_pad * (D * itemsize + 8) + 2 * b_pad * D * itemsize)

    out = pl.pallas_call(
        kernel,
        out_shape=jax.ShapeDtypeStruct((b_pad, n_pad), jnp.float32),
        grid_spec=pltpu.PrefetchScalarGridSpec(
            num_scalar_prefetch=1,                       # neg ids -> SMEM
            grid=(b_pad // tb, n_pad // tn),
            in_specs=[
                pl.BlockSpec((tb, 1, D), lambda b, n, ids: (b, 0, 0)),
                pl.BlockSpec((tb, 1, D), lambda b, n, ids: (b, 0, 0)),
                pl.BlockSpec(memory_space=pl.ANY),       # entity table stays in HBM
            ],
            out_specs=pl.BlockSpec((tb, tn), lambda b, n, ids: (b, n)),
            scratch_shapes=[
                pltpu.VMEM((tb * tn, D), entity_table.dtype),
                pltpu.SemaphoreType.DMA((1,)),
            ],
        ),
        compiler_params=pltpu.CompilerParams(
            dimension_semantics=("parallel", "parallel")),
        cost_estimate=cost,
    )(neg_ids.astype(jnp.int32), single_a, single_b, entity_table)
    return out[:B, :N]


class KGEModelJax:
    """JAX/Pallas port of KGEModel ('TransE'). Forward scoring only."""

    def __init__(self, nentity, nrelation, gamma=12.0, hidden_dim=500, key=None):
        self.model_name = "TransE"
        self.nentity = nentity
        self.nrelation = nrelation
        self.hidden_dim = hidden_dim
        self.epsilon = 2.0
        self.gamma = float(gamma)
        self.embedding_range = (self.gamma + self.epsilon) / hidden_dim

        # lane-dense storage: pad the embedding dim to a multiple of 128
        # (zero pad columns contribute 0 to the L1 norm).
        self.padded_dim = _round_up(hidden_dim, _LANE)

        k1, k2 = jax.random.split(key)
        ent = jax.random.uniform(k1, (nentity, hidden_dim), dtype=jnp.float32,
                                 minval=-self.embedding_range, maxval=self.embedding_range)
        rel = jax.random.uniform(k2, (nrelation, hidden_dim), dtype=jnp.float32,
                                 minval=-self.embedding_range, maxval=self.embedding_range)
        pad = self.padded_dim - hidden_dim
        if pad:
            ent = jnp.pad(ent, ((0, 0), (0, pad)))
            rel = jnp.pad(rel, ((0, 0), (0, pad)))
        # bf16 tables: halves HBM traffic of this memory-bound kernel; the L1 sum
        # accumulates in f32 in-kernel.
        # TODO(synk): if these tables are trained, the pad columns must stay zero.
        self.entity_embedding = ent.astype(jnp.bfloat16)
        self.relation_embedding = rel.astype(jnp.bfloat16)

    def __call__(self, sample, mode="single"):
        if mode == "single":
            pos = sample                                           # (B, 3)
            head = self.entity_embedding[pos[:, 0]][None]          # (1, B, D): fold the batch
            relation = self.relation_embedding[pos[:, 1]][None]    # onto the candidate axis so
            tail = self.entity_embedding[pos[:, 2]][None]          # the output stays lane-dense
            score = transe_score(head, relation, tail, self.gamma, mode=mode)  # (1, B)
            return score.reshape(-1, 1)                            # (B, 1) like the PyTorch model
        pos, neg = sample
        if mode == "head-batch":
            single_a = self.relation_embedding[pos[:, 1]][:, None, :]   # relation
            single_b = self.entity_embedding[pos[:, 2]][:, None, :]     # tail
        elif mode == "tail-batch":
            single_a = self.entity_embedding[pos[:, 0]][:, None, :]     # head
            single_b = self.relation_embedding[pos[:, 1]][:, None, :]   # relation
        else:
            raise ValueError(f"unknown mode {mode}")
        # (B,N,D) candidate gather is fused into the kernel (no XLA gather materialization).
        return transe_score_fused_gather(neg, single_a, single_b,
                                         self.entity_embedding, self.gamma, mode)


def _reference_score(head, relation, tail, gamma, mode):
    h, r, t = jnp.broadcast_arrays(head, relation, tail)   # bf16 elementwise, like the kernel
    s = h * (r * t) if mode == "head-batch" else h + r - t
    return gamma - jnp.sum(jnp.abs(s).astype(jnp.float32), axis=2)


def _check(model, positive_sample, negative_sample):
    pos_score = model(positive_sample, mode="single")                       # (B, 1)
    neg_tb = model((positive_sample, negative_sample), "tail-batch")        # (B, N)
    neg_hb = model((positive_sample, negative_sample), "head-batch")        # (B, N)
    jax.block_until_ready((pos_score, neg_tb, neg_hb))

    def gather(mode):
        h = model.entity_embedding[positive_sample[:, 0]][:, None, :]
        r = model.relation_embedding[positive_sample[:, 1]][:, None, :]
        t = model.entity_embedding[positive_sample[:, 2]][:, None, :]
        if mode == "head-batch":
            h = model.entity_embedding[negative_sample]
        elif mode == "tail-batch":
            t = model.entity_embedding[negative_sample]
        return h, r, t

    for mode, got in (("single", pos_score), ("tail-batch", neg_tb), ("head-batch", neg_hb)):
        h, r, t = gather(mode)
        want = _reference_score(h, r, t, model.gamma, mode)
        assert got.shape == want.shape, (mode, got.shape, want.shape)
        assert jnp.allclose(got, want, atol=2e-3, rtol=1e-3), (
            mode, float(jnp.max(jnp.abs(got - want))))


if __name__ == "__main__":
    key = jax.random.PRNGKey(0)
    k_model, k_pos, k_neg = jax.random.split(key, 3)

    nentity, nrelation, hidden_dim = 64, 8, 32       # small, consistent shapes
    model = KGEModelJax(nentity, nrelation, gamma=12.0, hidden_dim=hidden_dim, key=k_model)

    def make_samples(kp, kn, batch, num_neg):
        kp1, kp2, kp3 = jax.random.split(kp, 3)
        pos = jnp.stack([jax.random.randint(kp1, (batch,), 0, nentity),
                         jax.random.randint(kp2, (batch,), 0, nrelation),
                         jax.random.randint(kp3, (batch,), 0, nentity)], axis=1)   # (B, 3)
        neg = jax.random.randint(kn, (batch, num_neg), 0, nentity)                 # (B, N)
        return pos, neg

    # small shapes (single grid step)
    pos, neg = make_samples(k_pos, k_neg, batch=2, num_neg=8)
    _check(model, pos, neg)

    # moderately larger shapes: exercises batch-axis tiling and the B/N padding paths
    k_pos2, k_neg2 = jax.random.split(jax.random.PRNGKey(1))
    pos2, neg2 = make_samples(k_pos2, k_neg2, batch=9, num_neg=200)
    _check(model, pos2, neg2)

    # TODO(synk): KGEModel.train_step's logsigmoid loss / optimizer update are training
    # glue outside the scoring hot path and are not implemented as kernels.
    print("KERNEL_OK")
</pallas_src>

<mosaic_0001>
module attributes {stable_mosaic.version = 11 : i64} {
  func.func @_transe_dense_kernel(%arg0: i32, %arg1: i32, %arg2: memref<1x8x128xbf16, #tpu.memory_space<vmem>>, %arg3: memref<1x8x128xbf16, #tpu.memory_space<vmem>>, %arg4: memref<1x8x128xbf16, #tpu.memory_space<vmem>>, %arg5: memref<1x8xf32, #tpu.memory_space<vmem>>) attributes {dimension_semantics = [#tpu.dimension_semantics<parallel>, #tpu.dimension_semantics<parallel>], iteration_bounds = array<i64: 1, 1>, scalar_prefetch = 0 : i64, scratch_operands = 0 : i64, tpu.core_type = #tpu.core_type<tc>, window_params = [{transform_indices = @transform_0, window_bounds = array<i64: 1, 8, 128>}, {transform_indices = @transform_1, window_bounds = array<i64: 1, 8, 128>}, {transform_indices = @transform_2, window_bounds = array<i64: 1, 8, 128>}, {transform_indices = @transform_3, window_bounds = array<i64: 1, 8>}]} {
    %c0 = arith.constant 0 : index
    %c0_0 = arith.constant 0 : index
    %c0_1 = arith.constant 0 : index
    %0 = vector.load %arg2[%c0, %c0_0, %c0_1] : memref<1x8x128xbf16, #tpu.memory_space<vmem>>, vector<1x8x128xbf16>
    %c0_2 = arith.constant 0 : index
    %c0_3 = arith.constant 0 : index
    %c0_4 = arith.constant 0 : index
    %1 = vector.load %arg3[%c0_2, %c0_3, %c0_4] : memref<1x8x128xbf16, #tpu.memory_space<vmem>>, vector<1x8x128xbf16>
    %c0_5 = arith.constant 0 : index
    %c0_6 = arith.constant 0 : index
    %c0_7 = arith.constant 0 : index
    %2 = vector.load %arg4[%c0_5, %c0_6, %c0_7] : memref<1x8x128xbf16, #tpu.memory_space<vmem>>, vector<1x8x128xbf16>
    %3 = arith.addf %0, %1 : vector<1x8x128xbf16>
    %4 = arith.subf %3, %2 : vector<1x8x128xbf16>
    %5 = math.absf %4 : vector<1x8x128xbf16>
    %6 = arith.extf %5 : vector<1x8x128xbf16> to vector<1x8x128xf32>
    %cst = arith.constant dense<0.000000e+00> : vector<1x8xf32>
    %7 = vector.multi_reduction <add>, %6, %cst [2] : vector<1x8x128xf32> to vector<1x8xf32>
    %cst_8 = arith.constant 1.200000e+01 : f32
    %8 = vector.broadcast %cst_8 : f32 to vector<1x8xf32>
    %9 = arith.subf %8, %7 : vector<1x8xf32>
    %c0_9 = arith.constant 0 : index
    %c0_10 = arith.constant 0 : index
    %10 = vector.load %arg5[%c0_9, %c0_10] : memref<1x8xf32, #tpu.memory_space<vmem>>, vector<1x8xf32>
    tpu.vector_store %arg5[%c0_9, %c0_10], %9 {strides = array<i32>} : memref<1x8xf32, #tpu.memory_space<vmem>>, vector<1x8xf32>,
    return
  }
  func.func @transform_0(%arg0: i32, %arg1: i32) -> (i32, i32, i32) {
    %c0_i32 = arith.constant 0 : i32
    %c0_i32_0 = arith.constant 0 : i32
    return %arg0, %arg1, %c0_i32 : i32, i32, i32
  }
  func.func @transform_1(%arg0: i32, %arg1: i32) -> (i32, i32, i32) {
    %c0_i32 = arith.constant 0 : i32
    %c0_i32_0 = arith.constant 0 : i32
    return %arg0, %arg1, %c0_i32 : i32, i32, i32
  }
  func.func @transform_2(%arg0: i32, %arg1: i32) -> (i32, i32, i32) {
    %c0_i32 = arith.constant 0 : i32
    %c0_i32_0 = arith.constant 0 : i32
    return %arg0, %arg1, %c0_i32 : i32, i32, i32
  }
  func.func @transform_3(%arg0: i32, %arg1: i32) -> (i32, i32) {
    %c0_i32 = arith.constant 0 : i32
    return %arg0, %arg1 : i32, i32
  }
}

</mosaic_0001>

<bundles_post_ra>
// kernel: tpu_custom_call.1
= control target key start
LH: loop header
LB: loop body
LE: loop exit
PB: predicated region body
PF: predicated region fallthrough
CT: control target
= control target key end

     0   :  { %8 = vsyncpa [#allocation3], 0  ;;  %s212_s0 = inlined_call_operand.hbm [shape: bf16[1,8,128], index: 0, kind: input, shape index: {}]   ;;  %s213_s1 = inlined_call_operand.hbm [shape: bf16[1,8,128], index: 1, kind: input, shape index: {}]   ;;  %s214_s2 = inlined_call_operand.hbm [shape: bf16[1,8,128], index: 2, kind: input, shape index: {}]   ;;  %s215_s3 = inlined_call_operand.hbm [shape: f32[1,8], index: 3, kind: output, shape index: {}]  }
   0x1   :  { %9 = vsyncpa [#allocation6], 0 }
   0x2   :  { %10 = vsyncpa [#allocation4], 0  ;;  %s176_s12 = smov [#allocation5]   ;;  %s177_s14 = smov [#allocation2]  }
   0x3   :  { %s27_s13 = sshll.u32 %s176_s12, 4  ;;  %s17_s15 = sshll.u32 %s177_s14, 4  ;;  %s28_s13 = int_to_ptr.vmem [resolvable:$true] %s27_s13  ;;  %s18_s15 = int_to_ptr.vmem [resolvable:$true] %s17_s15 }
   0x4   :  { %s98_s16 = scalar_lea.vmem %s28_s13, 64  ;;  %p103_p1 = scmp.lt.s32.totalorder %s28_s13, %s28_s13 }
   0x5   :  { %p99_p0 = scmp.ne.s32.totalorder %s28_s13, %s98_s16  ;;  %p104_p2 = scmp.lt.s32.totalorder %s98_s16, %s98_s16 }
   0x7   :  { %p105_p3 = por %p104_p2, %p103_p1 }
   0x9   :  { %p106_p4 = pnand %p105_p3, %p99_p0 }
   0xb   :  { %109 = shalt.err (!%p106_p4)
}
   0xc   :  { %30 = dma.hbm_to_vmem [thread:$0]  %s213_s1, 64, %s28_s13, [#allocation6]  }
   0xd   :  { %s118_s19 = scalar_lea.vmem %s18_s15, 64  ;;  %p123_p6 = scmp.lt.s32.totalorder %s18_s15, %s18_s15 }
   0xe   :  { %p119_p5 = scmp.ne.s32.totalorder %s18_s15, %s118_s19  ;;  %p124_p7 = scmp.lt.s32.totalorder %s118_s19, %s118_s19 }
  0x10   :  { %p125_p8 = por %p124_p7, %p123_p6 }
  0x12   :  { %p126_p9 = pnand %p125_p8, %p119_p5 }
  0x14   :  { %129 = shalt.err (!%p126_p9)
}
  0x15   :  { %20 = dma.hbm_to_vmem [thread:$0]  %s212_s0, 64, %s18_s15, [#allocation3]  }
  0x16   :  { %s178_s22 = smov [#allocation7]  }
  0x17   :  { %s37_s23 = sshll.u32 %s178_s22, 4  ;;  %s38_s23 = int_to_ptr.vmem [resolvable:$true] %s37_s23 }
  0x18   :  { %s138_s24 = scalar_lea.vmem %s38_s23, 64  ;;  %p143_p11 = scmp.lt.s32.totalorder %s38_s23, %s38_s23 }
  0x19   :  { %p139_p10 = scmp.ne.s32.totalorder %s38_s23, %s138_s24  ;;  %p144_p12 = scmp.lt.s32.totalorder %s138_s24, %s138_s24 }
  0x1b   :  { %p145_p13 = por %p144_p12, %p143_p11 }
  0x1d   :  { %p146_p0 = pnand %p145_p13, %p139_p10 }
  0x1f   :  { %149 = shalt.err (!%p146_p0)
}
  0x20   :  { %40 = dma.hbm_to_vmem [thread:$0]  %s214_s2, 64, %s38_s23, [#allocation6]  }
  0x21   :  { %170 = dma.done.wait [#allocation3], 64  }
  0x22   :  { %171 = vsyncadd [#allocation3], 4294967232 }
  0x23   :  { %172 = dma.done.wait [#allocation6], 128  }
  0x24   :  { %173 = vsyncadd [#allocation6], 4294967168  ;;  %v50_v0 = vld [vmem:[#allocation2] sm:$0xf]  ;;  %v51_v1 = vld [vmem:[#allocation5] sm:$0xf]  ;;  %v61_v7 = vlaneseq }
  0x25   :  { %v52_v2 = vld [vmem:[#allocation7] sm:$0xf]  ;;  %v53_v3 = vadd.bf16 %v51_v1, %v50_v0  ;;  %s179_s0 = smov [#allocation8]   ;;  %vm68_vm0 = vcmask 57344  }
  0x26   :  { %v62_v8 = vand.u32 127, %v61_v7  ;;  %v64_v9 = vshrl.u32 %v61_v7, 7  ;;  %s76_s26 = sshll.u32 %s179_s0, 4  ;;  %s77_s26 = int_to_ptr.vmem [resolvable:$true] %s76_s26 }
  0x27   :  { %v54_v4 = vsub.bf16 %v53_v3, %v52_v2  ;;  %s150_s2 = scalar_lea.vmem %s77_s26, 16  ;;  %s154_s27 = scalar_lea.vmem %s77_s26, 32 }
  0x28   :  { %v65_v10 = vsub.s32 %v62_v8, %v64_v9  ;;  %p151_p1 = scmp.ne.s32.totalorder %s77_s26, %s150_s2  ;;  %p155_p2 = scmp.lt.s32.totalorder %s77_s26, %s77_s26 }
  0x29   :  { %v55_v5 = vand.u32 2147450879, %v54_v4  ;;  %p156_p3 = scmp.lt.s32.totalorder %s154_s27, %s150_s2 }
  0x2b   :  { %v56_v6 = vunpack.c.l.bf16 %v55_v5  ;;  %p157_p4 = por %p156_p3, %p155_p2 }
  0x2d   :  { %57 = vadd.xlane.f32.xlu0 %v56_v6  ;;  %p158_p5 = pnand %p157_p4, %p151_p1 }
  0xb6   :  { %v58_v11 = vpop.xlane.xlu0 %57 }
  0xb7   :  { %v59_v12 = vsub.f32 12.0, %v58_v11 }
  0xb9   :  { %v66_v13 = vrot.slane %v59_v12, %v65_v10 }
  0xbb   :  { %69 = vst.msk [vmem:[#allocation8] sm:$0x1] %vm68_vm0, %v66_v13 }
  0xbc   :  { %161 = shalt.err (!%p158_p5)
}
  0xbd   :  { %79 = dma.vmem_to_hbm [thread:$0]  %s77_s26, 16, %s215_s3, [#allocation4]  }
  0xbe   :  { %174 = dma.done.wait [#allocation4], 16  }
  0xbf   :  { %175 = vsyncadd [#allocation4], 4294967280 }
  0xc0   :  { %83 = vsyncpa [#allocation3], 1 }
  0xc1   :  { %84 = vsyncpa [#allocation6], 1 }
  0xc2   :  { %85 = vsyncpa [#allocation4], 1 }

</bundles_post_ra>
